<compile_context>
chip_gen: v6e
topology: v6e:2x2x1
jax: 0.10.0
libtpu: 0.0.40
codegen_flags: <defaults>
</compile_context>

<pallas_src>
import functools

import jax
import jax.numpy as jnp
from jax.experimental import pallas as pl
from jax.experimental.pallas import tpu as pltpu

# ----------------------------- configuration --------------------------------
B = 2            # batch
L_IN = 8         # encoder input seq len
L_TGT = 16       # decoder / classifier target seq len
H = 32           # encoder hidden size == decoder n_embd == embed_size
NZ = 32          # latent size (== H, as CARA asserts)
V_ENC = 48       # encoder vocab (stub)
V_DEC = 64       # decoder vocab
LABEL_SIZE = 2
PAD_TOKEN_ID = 0
BETA_CLS = 1.0
LATENT_SCALE_FACTOR = 1.0

ROWS_T = B * L_TGT          # 32 — row count of the packed id / aux slabs
assert B * L_IN <= ROWS_T and B <= ROWS_T

# --- packed weight slab layout (rows x 128 lanes, every chunk 8-row aligned) ---
ENC_WTE_R0 = 0              # (V_ENC, H)      encoder embedding table (stub)
POOLER_R0 = 48              # (H, H)          pooler weight
LATENT_R0 = 80              # (H, NZ + 2)     [linear_w | linear_w @ heads_w]
GEN_R0 = 112                # (NZ, 2)         gen_w @ heads_w (folded gen path)
LABEL_R0 = 144              # (LABEL_SIZE, NZ) label embedding
DEC_R0 = 152                # (V_DEC, H + 3)  [dec_wte | dec_wte @ conv_fc]
DECT_R0 = 216               # (H, V_DEC)      dec_wte.T (pre-transposed)
BIAS_R0 = 248               # 4 bias rows: pooler_b / heads_b / gen_b' / cls_b'
W_ROWS = 256
SLAB_LANES = 128

# columns of the packed (8, 128) output slab
COL_ENC_DIS, COL_ENC_CLS, COL_GEN_DIS, COL_GEN_CLS, COL_TXT_CLS, COL_LOSS_REC = range(6)
OUT_ROWS = 8


def _vmem_spec():
    return pl.BlockSpec(memory_space=pltpu.MemorySpace.VMEM)


# ----------------------------- fused Pallas kernel ----------------------------
def cara_fused_kernel(int_ref, aux_ref, w_ref, out_ref, *, pad_id):
    f32 = jnp.float32

    ints = int_ref[...]                          # (ROWS_T, 4) int32
    tgt_col = ints[:, 0:1]                       # decoder input ids
    tgt_next_col = ints[:, 1:2]                  # shifted targets (pad-filled)
    ids_enc_col = ints[:, 2:3]                   # encoder ids (padded rows masked)
    lab_col = ints[0:B, 3:4]                     # conditional labels

    aux = aux_ref[...]                           # (ROWS_T, NZ + 1) f32
    noise = aux[0:B, 0:NZ]                       # (B, NZ)
    mask_col = aux[:, NZ:NZ + 1]                 # (ROWS_T, 1), zeros past B*L_IN

    biases = w_ref[BIAS_R0:BIAS_R0 + 8, :]       # (8, 128)
    pooler_b = biases[0:1, 0:H]
    heads_b = biases[1:2, 0:2]
    gen_b2 = biases[2:3, 0:2]
    cls_b = biases[3:4, 0:1]

    # ---- encoder stub: one-hot embed -> masked mean -> tanh pooler ----------
    # TODO(synk): stand-in for the external BERT encoder's pooled output; the
    # full transformer is not reproduced.  (Out-of-range / pad ids map to the
    # zero vector via the one-hot lookup.)
    onehot_enc = (ids_enc_col == jax.lax.broadcasted_iota(
        jnp.int32, (ROWS_T, V_ENC), 1)).astype(f32)                  # (ROWS_T, V_enc)
    emb_enc = jnp.dot(onehot_enc, w_ref[ENC_WTE_R0:ENC_WTE_R0 + V_ENC, 0:H],
                      preferred_element_type=f32) * mask_col         # (ROWS_T, H)
    summed = jnp.sum(emb_enc[0:B * L_IN].reshape(B, L_IN, H), axis=1)      # (B, H)
    cnt = jnp.sum(mask_col[0:B * L_IN].reshape(B, L_IN, 1), axis=1)        # (B, 1)
    pooled_pre = summed / jnp.maximum(cnt, 1.0)                      # exact divide
    pooled = jnp.tanh(jnp.dot(pooled_pre, w_ref[POOLER_R0:POOLER_R0 + H, 0:H],
                              preferred_element_type=f32) + pooler_b)

    # ---- latent path, widened: one matmul -> latent_z and both head logits --
    lat = jnp.dot(pooled, w_ref[LATENT_R0:LATENT_R0 + H, :],
                  preferred_element_type=f32)                        # (B, 128)
    latent_z = lat[:, 0:NZ]
    enc_heads = lat[:, NZ:NZ + 2] + heads_b                          # [dis | cls]

    # ---- folded generator path: gen_heads = noise @ (gen_w@heads_w) + b' ----
    gen = jnp.dot(noise, w_ref[GEN_R0:GEN_R0 + NZ, :],
                  preferred_element_type=f32)                        # (B, 128)
    gen_heads = gen[:, 0:2] + gen_b2

    # ---- label embedding + past ---------------------------------------------
    lab_onehot = (lab_col == jax.lax.broadcasted_iota(
        jnp.int32, (B, LABEL_SIZE), 1)).astype(f32)
    lab_emb = jnp.dot(lab_onehot, w_ref[LABEL_R0:LABEL_R0 + LABEL_SIZE, 0:NZ],
                      preferred_element_type=f32)                    # (B, NZ)
    past = latent_z + lab_emb

    # ---- target embedding (+ folded classifier taps) in one wide matmul -----
    v_iota = jax.lax.broadcasted_iota(jnp.int32, (ROWS_T, V_DEC), 1)
    onehot_tgt = (tgt_col == v_iota).astype(f32)
    onehot_next = (tgt_next_col == v_iota).astype(f32)
    dec_out = jnp.dot(onehot_tgt, w_ref[DEC_R0:DEC_R0 + V_DEC, :],
                      preferred_element_type=f32)                    # (ROWS_T, 128)
    emb_tgt = dec_out[:, 0:H]                                        # (ROWS_T, H)
    cls_taps = dec_out[:, H:H + 3]                                   # emb @ W_k @ fc_w

    # ---- decoder stub: hidden = emb + past, tied LM head, masked CE ---------
    # TODO(synk): stand-in for the external GPT-2 decoder's token-level CE loss
    # (tied-embedding LM head conditioned on `past`); full transformer not
    # reproduced.
    hidden = (emb_tgt.reshape(B, L_TGT, H) + past[:, None, :]).reshape(ROWS_T, H)
    logits = jnp.dot(hidden, w_ref[DECT_R0:DECT_R0 + H, 0:V_DEC],
                     preferred_element_type=f32)                     # (ROWS_T, V_dec)
    mx = jnp.max(logits, axis=-1, keepdims=True)
    lse = mx + jnp.log(jnp.sum(jnp.exp(logits - mx), axis=-1, keepdims=True))
    tgt_logit = jnp.sum(logits * onehot_next, axis=-1, keepdims=True)
    nll = lse - tgt_logit                                            # (ROWS_T, 1)
    lmask = (tgt_next_col != pad_id).astype(f32)
    loss_rec = jnp.sum(nll * lmask) / jnp.maximum(jnp.sum(lmask), 1.0)

    # ---- TextClassifier: Conv1d(k=3) + mean + Linear, fully folded ----------
    # cls[b] = (1/Lo) * sum_{l,k} emb[b, l+k] @ W_k @ fc_w + (conv_b@fc_w + fc_b)
    # The data term is a masked per-batch sum of cls_taps with a static tap mask.
    lo = L_TGT - 2
    pos = jax.lax.broadcasted_iota(jnp.int32, (B, L_TGT, 3), 1).reshape(ROWS_T, 3)
    kk = jax.lax.broadcasted_iota(jnp.int32, (ROWS_T, 3), 1)
    tap_ok = ((pos >= kk) & (pos <= kk + (lo - 1))).astype(f32)
    cls_row = jnp.sum(cls_taps * tap_ok, axis=1, keepdims=True)      # (ROWS_T, 1)
    cls_sum = jnp.sum(cls_row.reshape(B, L_TGT, 1), axis=1)          # (B, 1)
    cls_logit = cls_sum * (1.0 / lo) + cls_b

    # ---- pack every small result into one full-tile slab, single store ------
    loss_col = jnp.zeros((B, 1), f32) + loss_rec
    vals = jnp.concatenate([enc_heads, gen_heads, cls_logit, loss_col], axis=1)  # (B, 6)
    slab = jnp.concatenate([vals, jnp.zeros((B, SLAB_LANES - 6), f32)], axis=1)
    slab = jnp.concatenate([slab, jnp.zeros((OUT_ROWS - B, SLAB_LANES), f32)], axis=0)
    out_ref[...] = slab                                              # (8, 128)


def cara_fused_call(int_slab, aux_slab, w_slab):
    # Single gridless pallas_call: total footprint << VMEM, every array used
    # once.  TODO(synk): if B/L/V ever scale up, add a leading batch grid axis
    # with dimension_semantics=("parallel",) to use both TensorCores on v7x.
    return pl.pallas_call(
        functools.partial(cara_fused_kernel, pad_id=PAD_TOKEN_ID),
        out_shape=jax.ShapeDtypeStruct((OUT_ROWS, SLAB_LANES), jnp.float32),
        in_specs=[_vmem_spec()] * 3,
        out_specs=_vmem_spec(),
    )(int_slab, aux_slab, w_slab)


# ----------------------------- plain-JAX glue ---------------------------------
def bce_with_logits(x, y):
    return jnp.mean(jnp.maximum(x, 0.0) - x * y + jnp.log1p(jnp.exp(-jnp.abs(x))))


def pred_and_acc(pred_logits_1d, true_labels):
    # label_size <= 2 branch of CARA._pred_and_acc
    pred = (pred_logits_1d >= 0).astype(jnp.int32)
    loss = bce_with_logits(pred_logits_1d, true_labels.astype(jnp.float32))
    acc = (pred == true_labels).astype(jnp.float32)
    return pred, acc, loss


def pack_weights(p):
    """One-time, outside-jit weight packing into a single (W_ROWS, 128) f32 slab."""
    heads_w = jnp.concatenate([p['dis_w'], p['lcls_w']], axis=1)          # (NZ, 2)
    heads_b = jnp.concatenate([p['dis_b'], p['lcls_b']], axis=1)          # (1, 2)
    latent_rhs = jnp.concatenate([p['linear_w'], p['linear_w'] @ heads_w], axis=1)
    gen_fw = p['gen_w'] @ heads_w                                         # (NZ, 2)
    gen_fb = p['gen_b'] @ heads_w + heads_b                               # (1, 2)
    conv_fc = jnp.concatenate([p['conv_w0'] @ p['fc_w'],
                               p['conv_w1'] @ p['fc_w'],
                               p['conv_w2'] @ p['fc_w']], axis=1)         # (H, 3)
    dec_rhs = jnp.concatenate([p['dec_wte'], p['dec_wte'] @ conv_fc], axis=1)
    cls_b = p['conv_b'] @ p['fc_w'] + p['fc_b']                           # (1, 1)

    slab = jnp.zeros((W_ROWS, SLAB_LANES), jnp.float32)

    def put(s, r0, m):
        r, c = m.shape
        return s.at[r0:r0 + r, 0:c].set(m)

    slab = put(slab, ENC_WTE_R0, p['enc_wte'])
    slab = put(slab, POOLER_R0, p['pooler_w'])
    slab = put(slab, LATENT_R0, latent_rhs)
    slab = put(slab, GEN_R0, gen_fw)
    slab = put(slab, LABEL_R0, p['label_emb'])
    slab = put(slab, DEC_R0, dec_rhs)
    slab = put(slab, DECT_R0, p['dec_wte'].T)
    slab = put(slab, BIAS_R0 + 0, p['pooler_b'])
    slab = put(slab, BIAS_R0 + 1, heads_b)
    slab = put(slab, BIAS_R0 + 2, gen_fb)
    slab = put(slab, BIAS_R0 + 3, cls_b)
    return slab


def cara_forward(w_slab, input_seq_ids, tgt_seq_ids, cond_labels,
                 attention_mask, random_noise):
    """Training-mode CARA.forward (self.training == True branch)."""
    ones_label = jnp.ones_like(cond_labels, dtype=jnp.float32)
    zeros_label = jnp.zeros_like(cond_labels, dtype=jnp.float32)

    # wrapper-side layout plumbing: pack the tiny id / aux arrays into 2 slabs
    tgt_flat = tgt_seq_ids.reshape(-1).astype(jnp.int32)
    tgt_next_flat = jnp.concatenate(
        [tgt_seq_ids[:, 1:], jnp.full((B, 1), PAD_TOKEN_ID, jnp.int32)],
        axis=1).reshape(-1).astype(jnp.int32)
    ids_enc_pad = jnp.zeros((ROWS_T,), jnp.int32).at[0:B * L_IN].set(
        input_seq_ids.reshape(-1).astype(jnp.int32))
    labels_pad = jnp.zeros((ROWS_T,), jnp.int32).at[0:B].set(
        cond_labels.astype(jnp.int32))
    int_slab = jnp.stack([tgt_flat, tgt_next_flat, ids_enc_pad, labels_pad], axis=1)

    noise_pad = jnp.zeros((ROWS_T, NZ), jnp.float32).at[0:B].set(
        random_noise.astype(jnp.float32))
    mask_pad = jnp.zeros((ROWS_T, 1), jnp.float32).at[0:B * L_IN, 0].set(
        attention_mask.reshape(-1).astype(jnp.float32))
    aux_slab = jnp.concatenate([noise_pad, mask_pad], axis=1)        # (ROWS_T, NZ+1)

    slab = cara_fused_call(int_slab, aux_slab, w_slab)

    prob_enc_z_dis = slab[0:B, COL_ENC_DIS]
    enc_cls_logits = slab[0:B, COL_ENC_CLS]
    prob_gen_z_dis = slab[0:B, COL_GEN_DIS]
    cls_logits = slab[0:B, COL_TXT_CLS]
    loss_rec = slab[0, COL_LOSS_REC]

    loss_gen = bce_with_logits(prob_gen_z_dis, zeros_label)
    loss_enc = bce_with_logits(prob_enc_z_dis, ones_label)
    loss_lsd = loss_gen + loss_enc
    loss_lsg = bce_with_logits(prob_gen_z_dis, ones_label)
    acc_enc_z_dis = ((prob_enc_z_dis >= 0).astype(jnp.float32) == ones_label
                     ).astype(jnp.float32)
    acc_gen_z_dis = ((prob_gen_z_dis >= 0).astype(jnp.float32) == zeros_label
                     ).astype(jnp.float32)

    _, acc_encode_z_cls, loss_lsc = pred_and_acc(enc_cls_logits, cond_labels)
    loss_enc = 1.0 - loss_lsc   # matches original CARA's overwrite

    pred_cls, acc_cls, loss_cls = pred_and_acc(cls_logits, cond_labels)

    loss_latent_space = loss_enc + loss_lsc + (loss_lsd + loss_lsg)
    loss_latent_space = loss_latent_space + BETA_CLS * loss_cls
    loss = loss_rec + LATENT_SCALE_FACTOR * loss_latent_space

    # TODO(synk): eval-mode autoregressive sampling (top-k/top-p multinomial
    # generation with the external GPT-2 decoder) is not implemented.
    loss_dict = {'loss': loss, 'loss_rec': loss_rec, 'loss_encoder': loss_enc,
                 'loss_lsc': loss_lsc, 'loss_lsd': loss_lsd, 'loss_lsg': loss_lsg,
                 'loss_cls': loss_cls}
    acc_dict = {'acc_encode_z_dis': acc_enc_z_dis, 'acc_gen_z_dis': acc_gen_z_dis,
                'acc_encode_z_cls': acc_encode_z_cls, 'acc_cls': acc_cls}
    return loss_dict, acc_dict


# ----------------------------- parameter init ---------------------------------
def init_params(key):
    ks = jax.random.split(key, 16)
    s = 0.1
    # conv weight in PyTorch layout (C_out, C_in, K); stored as K slices (C_in, C_out)
    conv_w = s * jax.random.normal(ks[7], (H, H, 3), jnp.float32)
    label_emb = s * jax.random.normal(ks[6], (LABEL_SIZE, NZ), jnp.float32)
    label_emb = label_emb.at[0].set(0.0)   # padding_idx=0
    dec_wte = s * jax.random.normal(ks[5], (V_DEC, H), jnp.float32)  # tied with classifier
    return {
        'enc_wte':   s * jax.random.normal(ks[0], (V_ENC, H), jnp.float32),
        'pooler_w':  s * jax.random.normal(ks[1], (H, H), jnp.float32),
        'pooler_b':  s * jax.random.normal(ks[2], (1, H), jnp.float32),
        'linear_w':  s * jax.random.normal(ks[3], (H, NZ), jnp.float32),   # (in, out)
        'gen_w':     s * jax.random.normal(ks[4], (NZ, NZ), jnp.float32),
        'gen_b':     s * jax.random.normal(ks[8], (1, NZ), jnp.float32),
        'dis_w':     s * jax.random.normal(ks[9], (NZ, 1), jnp.float32),
        'dis_b':     s * jax.random.normal(ks[10], (1, 1), jnp.float32),
        'lcls_w':    s * jax.random.normal(ks[11], (NZ, 1), jnp.float32),
        'lcls_b':    s * jax.random.normal(ks[12], (1, 1), jnp.float32),
        'label_emb': label_emb,
        'dec_wte':   dec_wte,
        'conv_w0':   conv_w[:, :, 0].T,    # (C_in, C_out)
        'conv_w1':   conv_w[:, :, 1].T,
        'conv_w2':   conv_w[:, :, 2].T,
        'conv_b':    s * jax.random.normal(ks[13], (1, H), jnp.float32),
        'fc_w':      s * jax.random.normal(ks[14], (H, 1), jnp.float32),
        'fc_b':      s * jax.random.normal(ks[15], (1, 1), jnp.float32),
    }


# ----------------------------- main -------------------------------------------
if __name__ == "__main__":
    root = jax.random.PRNGKey(0)
    k_par, k_in, k_tgt, k_noise = jax.random.split(root, 4)

    params = init_params(k_par)
    w_slab = pack_weights(params)          # packed ONCE, outside the jitted step

    input_seq_ids = jax.random.randint(k_in, (B, L_IN), 1, V_ENC, dtype=jnp.int32)
    tgt_seq_ids = jax.random.randint(k_tgt, (B, L_TGT), 1, V_DEC, dtype=jnp.int32)
    tgt_seq_ids = tgt_seq_ids.at[:, -2:].set(PAD_TOKEN_ID)  # padding at the tail
    cond_labels = jnp.array([0, 1], dtype=jnp.int32)
    attention_mask = jnp.ones((B, L_IN), dtype=jnp.int32).at[1, -2:].set(0)
    random_noise = jax.random.normal(k_noise, (B, NZ), jnp.float32)

    loss_dict, acc_dict = jax.jit(cara_forward)(
        w_slab, input_seq_ids, tgt_seq_ids, cond_labels, attention_mask, random_noise)
    jax.block_until_ready(loss_dict)
    jax.block_until_ready(acc_dict)

    # light sanity checks: all losses finite, accuracies per-example
    for k, v in loss_dict.items():
        assert bool(jnp.isfinite(v).all()), f"non-finite loss {k}"
    for k, v in acc_dict.items():
        assert v.shape == (B,), f"bad acc shape for {k}"

    print("KERNEL_OK")
</pallas_src>

<mosaic_0001>
module attributes {stable_mosaic.version = 11 : i64} {
  func.func @cara_fused_kernel(%arg0: memref<32x4xi32, #tpu.memory_space<vmem>>, %arg1: memref<32x33xf32, #tpu.memory_space<vmem>>, %arg2: memref<256x128xf32, #tpu.memory_space<vmem>>, %arg3: memref<8x128xf32, #tpu.memory_space<vmem>>) attributes {dimension_semantics = [], scalar_prefetch = 0 : i64, scratch_operands = 0 : i64, tpu.core_type = #tpu.core_type<tc>} {
    %c0 = arith.constant 0 : index
    %c0_0 = arith.constant 0 : index
    %0 = vector.load %arg0[%c0, %c0_0] : memref<32x4xi32, #tpu.memory_space<vmem>>, vector<32x4xi32>
    %1 = vector.extract_strided_slice %0 {offsets = [0, 0], sizes = [32, 1], strides = [1, 1]} : vector<32x4xi32> to vector<32x1xi32>
    %2 = vector.extract_strided_slice %0 {offsets = [0, 1], sizes = [32, 1], strides = [1, 1]} : vector<32x4xi32> to vector<32x1xi32>
    %3 = vector.extract_strided_slice %0 {offsets = [0, 2], sizes = [32, 1], strides = [1, 1]} : vector<32x4xi32> to vector<32x1xi32>
    %4 = vector.extract_strided_slice %0 {offsets = [0, 3], sizes = [2, 1], strides = [1, 1]} : vector<32x4xi32> to vector<2x1xi32>
    %c0_1 = arith.constant 0 : index
    %c0_2 = arith.constant 0 : index
    %5 = vector.load %arg1[%c0_1, %c0_2] : memref<32x33xf32, #tpu.memory_space<vmem>>, vector<32x33xf32>
    %6 = vector.extract_strided_slice %5 {offsets = [0, 0], sizes = [2, 32], strides = [1, 1]} : vector<32x33xf32> to vector<2x32xf32>
    %7 = vector.extract_strided_slice %5 {offsets = [0, 32], sizes = [32, 1], strides = [1, 1]} : vector<32x33xf32> to vector<32x1xf32>
    %c248 = arith.constant 248 : index
    %c0_3 = arith.constant 0 : index
    %8 = vector.load %arg2[%c248, %c0_3] : memref<256x128xf32, #tpu.memory_space<vmem>>, vector<8x128xf32>
    %9 = vector.extract_strided_slice %8 {offsets = [0, 0], sizes = [1, 32], strides = [1, 1]} : vector<8x128xf32> to vector<1x32xf32>
    %10 = vector.extract_strided_slice %8 {offsets = [1, 0], sizes = [1, 2], strides = [1, 1]} : vector<8x128xf32> to vector<1x2xf32>
    %11 = vector.extract_strided_slice %8 {offsets = [2, 0], sizes = [1, 2], strides = [1, 1]} : vector<8x128xf32> to vector<1x2xf32>
    %12 = vector.extract_strided_slice %8 {offsets = [3, 0], sizes = [1, 1], strides = [1, 1]} : vector<8x128xf32> to vector<1x1xf32>
    %13 = tpu.iota {dimensions = array<i32: 1>} : vector<32x48xi32>
    %14 = vector.broadcast %3 : vector<32x1xi32> to vector<32x48xi32>
    %15 = arith.cmpi eq, %14, %13 : vector<32x48xi32>
    %16 = arith.extui %15 : vector<32x48xi1> to vector<32x48xi32>
    %17 = arith.sitofp %16 : vector<32x48xi32> to vector<32x48xf32>
    %c0_4 = arith.constant 0 : index
    %c0_5 = arith.constant 0 : index
    %18 = vector.load %arg2[%c0_4, %c0_5] : memref<256x128xf32, #tpu.memory_space<vmem>>, vector<48x32xf32>
    %cst = arith.constant dense<0.000000e+00> : vector<32x32xf32>
    %19 = tpu.matmul %17, %18, %cst {dimension_numbers = #tpu.dot_dimension_numbers<[1], [0], [0], [1], [0, 0, 1, 1], [], []>} : vector<32x48xf32>, vector<48x32xf32>, vector<32x32xf32> -> vector<32x32xf32>
    %20 = vector.broadcast %7 : vector<32x1xf32> to vector<32x32xf32>
    %21 = arith.mulf %19, %20 : vector<32x32xf32>
    %22 = vector.extract_strided_slice %21 {offsets = [0, 0], sizes = [16, 32], strides = [1, 1]} : vector<32x32xf32> to vector<16x32xf32>
    %23 = vector.shape_cast %22 : vector<16x32xf32> to vector<2x8x32xf32>
    %cst_6 = arith.constant dense<0.000000e+00> : vector<2x32xf32>
    %24 = vector.multi_reduction <add>, %23, %cst_6 [1] : vector<2x8x32xf32> to vector<2x32xf32>
    %25 = vector.extract_strided_slice %7 {offsets = [0, 0], sizes = [16, 1], strides = [1, 1]} : vector<32x1xf32> to vector<16x1xf32>
    %26 = vector.shape_cast %25 : vector<16x1xf32> to vector<2x8x1xf32>
    %cst_7 = arith.constant dense<0.000000e+00> : vector<2x1xf32>
    %27 = vector.multi_reduction <add>, %26, %cst_7 [1] : vector<2x8x1xf32> to vector<2x1xf32>
    %cst_8 = arith.constant 1.000000e+00 : f32
    %28 = vector.broadcast %cst_8 : f32 to vector<2x1xf32>
    %29 = arith.maximumf %27, %28 : vector<2x1xf32>
    %30 = vector.broadcast %29 : vector<2x1xf32> to vector<2x32xf32>
    %31 = arith.divf %24, %30 : vector<2x32xf32>
    %c48 = arith.constant 48 : index
    %c0_9 = arith.constant 0 : index
    %32 = vector.load %arg2[%c48, %c0_9] : memref<256x128xf32, #tpu.memory_space<vmem>>, vector<32x32xf32>
    %cst_10 = arith.constant dense<0.000000e+00> : vector<2x32xf32>
    %33 = tpu.matmul %31, %32, %cst_10 {dimension_numbers = #tpu.dot_dimension_numbers<[1], [0], [0], [1], [0, 0, 1, 1], [], []>} : vector<2x32xf32>, vector<32x32xf32>, vector<2x32xf32> -> vector<2x32xf32>
    %34 = vector.broadcast %9 : vector<1x32xf32> to vector<2x32xf32>
    %35 = arith.addf %33, %34 : vector<2x32xf32>
    %36 = math.tanh %35 : vector<2x32xf32>
    %c80 = arith.constant 80 : index
    %c0_11 = arith.constant 0 : index
    %37 = vector.load %arg2[%c80, %c0_11] : memref<256x128xf32, #tpu.memory_space<vmem>>, vector<32x128xf32>
    %cst_12 = arith.constant dense<0.000000e+00> : vector<2x128xf32>
    %38 = tpu.matmul %36, %37, %cst_12 {dimension_numbers = #tpu.dot_dimension_numbers<[1], [0], [0], [1], [0, 0, 1, 1], [], []>} : vector<2x32xf32>, vector<32x128xf32>, vector<2x128xf32> -> vector<2x128xf32>
    %39 = vector.extract_strided_slice %38 {offsets = [0, 0], sizes = [2, 32], strides = [1, 1]} : vector<2x128xf32> to vector<2x32xf32>
    %40 = vector.extract_strided_slice %38 {offsets = [0, 32], sizes = [2, 2], strides = [1, 1]} : vector<2x128xf32> to vector<2x2xf32>
    %41 = vector.broadcast %10 : vector<1x2xf32> to vector<2x2xf32>
    %42 = arith.addf %40, %41 : vector<2x2xf32>
    %c112 = arith.constant 112 : index
    %c0_13 = arith.constant 0 : index
    %43 = vector.load %arg2[%c112, %c0_13] : memref<256x128xf32, #tpu.memory_space<vmem>>, vector<32x128xf32>
    %cst_14 = arith.constant dense<0.000000e+00> : vector<2x128xf32>
    %44 = tpu.matmul %6, %43, %cst_14 {dimension_numbers = #tpu.dot_dimension_numbers<[1], [0], [0], [1], [0, 0, 1, 1], [], []>} : vector<2x32xf32>, vector<32x128xf32>, vector<2x128xf32> -> vector<2x128xf32>
    %45 = vector.extract_strided_slice %44 {offsets = [0, 0], sizes = [2, 2], strides = [1, 1]} : vector<2x128xf32> to vector<2x2xf32>
    %46 = vector.broadcast %11 : vector<1x2xf32> to vector<2x2xf32>
    %47 = arith.addf %45, %46 : vector<2x2xf32>
    %48 = tpu.iota {dimensions = array<i32: 1>} : vector<2x2xi32>
    %49 = vector.broadcast %4 : vector<2x1xi32> to vector<2x2xi32>
    %50 = arith.cmpi eq, %49, %48 : vector<2x2xi32>
    %51 = arith.extui %50 : vector<2x2xi1> to vector<2x2xi32>
    %52 = arith.sitofp %51 : vector<2x2xi32> to vector<2x2xf32>
    %c144 = arith.constant 144 : index
    %c0_15 = arith.constant 0 : index
    %53 = vector.load %arg2[%c144, %c0_15] : memref<256x128xf32, #tpu.memory_space<vmem>>, vector<2x32xf32>
    %cst_16 = arith.constant dense<0.000000e+00> : vector<2x32xf32>
    %54 = tpu.matmul %52, %53, %cst_16 {dimension_numbers = #tpu.dot_dimension_numbers<[1], [0], [0], [1], [0, 0, 1, 1], [], []>} : vector<2x2xf32>, vector<2x32xf32>, vector<2x32xf32> -> vector<2x32xf32>
    %55 = arith.addf %39, %54 : vector<2x32xf32>
    %56 = tpu.iota {dimensions = array<i32: 1>} : vector<32x64xi32>
    %57 = vector.broadcast %1 : vector<32x1xi32> to vector<32x64xi32>
    %58 = arith.cmpi eq, %57, %56 : vector<32x64xi32>
    %59 = arith.extui %58 : vector<32x64xi1> to vector<32x64xi32>
    %60 = arith.sitofp %59 : vector<32x64xi32> to vector<32x64xf32>
    %61 = vector.broadcast %2 : vector<32x1xi32> to vector<32x64xi32>
    %62 = arith.cmpi eq, %61, %56 : vector<32x64xi32>
    %63 = arith.extui %62 : vector<32x64xi1> to vector<32x64xi32>
    %64 = arith.sitofp %63 : vector<32x64xi32> to vector<32x64xf32>
    %c152 = arith.constant 152 : index
    %c0_17 = arith.constant 0 : index
    %65 = vector.load %arg2[%c152, %c0_17] : memref<256x128xf32, #tpu.memory_space<vmem>>, vector<64x128xf32>
    %cst_18 = arith.constant dense<0.000000e+00> : vector<32x128xf32>
    %66 = tpu.matmul %60, %65, %cst_18 {dimension_numbers = #tpu.dot_dimension_numbers<[1], [0], [0], [1], [0, 0, 1, 1], [], []>} : vector<32x64xf32>, vector<64x128xf32>, vector<32x128xf32> -> vector<32x128xf32>
    %67 = vector.extract_strided_slice %66 {offsets = [0, 0], sizes = [32, 32], strides = [1, 1]} : vector<32x128xf32> to vector<32x32xf32>
    %68 = vector.extract_strided_slice %66 {offsets = [0, 32], sizes = [32, 3], strides = [1, 1]} : vector<32x128xf32> to vector<32x3xf32>
    %69 = vector.shape_cast %67 : vector<32x32xf32> to vector<2x16x32xf32>
    %70 = vector.shape_cast %55 : vector<2x32xf32> to vector<2x1x32xf32>
    %71 = vector.broadcast %70 : vector<2x1x32xf32> to vector<2x16x32xf32>
    %72 = arith.addf %69, %71 : vector<2x16x32xf32>
    %73 = vector.shape_cast %72 : vector<2x16x32xf32> to vector<32x32xf32>
    %c216 = arith.constant 216 : index
    %c0_19 = arith.constant 0 : index
    %74 = vector.load %arg2[%c216, %c0_19] : memref<256x128xf32, #tpu.memory_space<vmem>>, vector<32x64xf32>
    %cst_20 = arith.constant dense<0.000000e+00> : vector<32x64xf32>
    %75 = tpu.matmul %73, %74, %cst_20 {dimension_numbers = #tpu.dot_dimension_numbers<[1], [0], [0], [1], [0, 0, 1, 1], [], []>} : vector<32x32xf32>, vector<32x64xf32>, vector<32x64xf32> -> vector<32x64xf32>
    %cst_21 = arith.constant dense<0xFF800000> : vector<32xf32>
    %76 = vector.multi_reduction <maximumf>, %75, %cst_21 [1] : vector<32x64xf32> to vector<32xf32>
    %77 = vector.shape_cast %76 : vector<32xf32> to vector<32x1xf32>
    %78 = vector.broadcast %77 : vector<32x1xf32> to vector<32x64xf32>
    %79 = arith.subf %75, %78 : vector<32x64xf32>
    %80 = math.exp %79 : vector<32x64xf32>
    %cst_22 = arith.constant dense<0.000000e+00> : vector<32xf32>
    %81 = vector.multi_reduction <add>, %80, %cst_22 [1] : vector<32x64xf32> to vector<32xf32>
    %82 = vector.shape_cast %81 : vector<32xf32> to vector<32x1xf32>
    %83 = math.log %82 : vector<32x1xf32>
    %84 = arith.addf %77, %83 : vector<32x1xf32>
    %85 = arith.mulf %75, %64 : vector<32x64xf32>
    %cst_23 = arith.constant dense<0.000000e+00> : vector<32xf32>
    %86 = vector.multi_reduction <add>, %85, %cst_23 [1] : vector<32x64xf32> to vector<32xf32>
    %87 = vector.shape_cast %86 : vector<32xf32> to vector<32x1xf32>
    %88 = arith.subf %84, %87 : vector<32x1xf32>
    %c0_i32 = arith.constant 0 : i32
    %89 = vector.broadcast %c0_i32 : i32 to vector<32x1xi32>
    %90 = arith.cmpi ne, %2, %89 : vector<32x1xi32>
    %91 = arith.extui %90 : vector<32x1xi1> to vector<32x1xi32>
    %92 = arith.sitofp %91 : vector<32x1xi32> to vector<32x1xf32>
    %93 = arith.mulf %88, %92 : vector<32x1xf32>
    %94 = vector.shape_cast %93 : vector<32x1xf32> to vector<1x32x1xf32>
    %cst_24 = arith.constant dense<0.000000e+00> : vector<1xf32>
    %95 = vector.multi_reduction <add>, %94, %cst_24 [1, 2] : vector<1x32x1xf32> to vector<1xf32>
    %96 = vector.shape_cast %95 : vector<1xf32> to vector<1x1x1xf32>
    %97 = vector.extract %96[0, 0, 0] : f32 from vector<1x1x1xf32>
    %98 = vector.shape_cast %92 : vector<32x1xf32> to vector<1x32x1xf32>
    %cst_25 = arith.constant dense<0.000000e+00> : vector<1xf32>
    %99 = vector.multi_reduction <add>, %98, %cst_25 [1, 2] : vector<1x32x1xf32> to vector<1xf32>
    %100 = vector.shape_cast %99 : vector<1xf32> to vector<1x1x1xf32>
    %101 = vector.extract %100[0, 0, 0] : f32 from vector<1x1x1xf32>
    %cst_26 = arith.constant 1.000000e+00 : f32
    %102 = arith.maximumf %101, %cst_26 : f32
    %103 = arith.divf %97, %102 : f32
    %104 = tpu.iota {dimensions = array<i32: 1>} : vector<2x16x3xi32>
    %105 = vector.shape_cast %104 : vector<2x16x3xi32> to vector<32x3xi32>
    %106 = tpu.iota {dimensions = array<i32: 1>} : vector<32x3xi32>
    %107 = arith.cmpi sge, %105, %106 : vector<32x3xi32>
    %c13_i32 = arith.constant 13 : i32
    %108 = vector.broadcast %c13_i32 : i32 to vector<32x3xi32>
    %109 = arith.addi %106, %108 : vector<32x3xi32>
    %110 = arith.cmpi sle, %105, %109 : vector<32x3xi32>
    %111 = arith.andi %107, %110 : vector<32x3xi1>
    %112 = arith.extui %111 : vector<32x3xi1> to vector<32x3xi32>
    %113 = arith.sitofp %112 : vector<32x3xi32> to vector<32x3xf32>
    %114 = arith.mulf %68, %113 : vector<32x3xf32>
    %cst_27 = arith.constant dense<0.000000e+00> : vector<32xf32>
    %115 = vector.multi_reduction <add>, %114, %cst_27 [1] : vector<32x3xf32> to vector<32xf32>
    %116 = vector.shape_cast %115 : vector<32xf32> to vector<32x1xf32>
    %117 = vector.shape_cast %116 : vector<32x1xf32> to vector<2x16x1xf32>
    %cst_28 = arith.constant dense<0.000000e+00> : vector<2x1xf32>
    %118 = vector.multi_reduction <add>, %117, %cst_28 [1] : vector<2x16x1xf32> to vector<2x1xf32>
    %cst_29 = arith.constant 0.0714285746 : f32
    %119 = vector.broadcast %cst_29 : f32 to vector<2x1xf32>
    %120 = arith.mulf %118, %119 : vector<2x1xf32>
    %121 = vector.broadcast %12 : vector<1x1xf32> to vector<2x1xf32>
    %122 = arith.addf %120, %121 : vector<2x1xf32>
    %cst_30 = arith.constant 0.000000e+00 : f32
    %123 = vector.broadcast %cst_30 : f32 to vector<2x1xf32>
    %124 = vector.broadcast %103 : f32 to vector<2x1xf32>
    %125 = arith.addf %123, %124 : vector<2x1xf32>
    %126 = tpu.concatenate %42, %47, %122, %125 in 1 : vector<2x2xf32>, vector<2x2xf32>, vector<2x1xf32>, vector<2x1xf32> -> vector<2x6xf32>
    %cst_31 = arith.constant 0.000000e+00 : f32
    %127 = vector.broadcast %cst_31 : f32 to vector<2x122xf32>
    %128 = tpu.concatenate %126, %127 in 1 : vector<2x6xf32>, vector<2x122xf32> -> vector<2x128xf32>
    %cst_32 = arith.constant 0.000000e+00 : f32
    %129 = vector.broadcast %cst_32 : f32 to vector<6x128xf32>
    %130 = tpu.concatenate %128, %129 in 0 : vector<2x128xf32>, vector<6x128xf32> -> vector<8x128xf32>
    %c0_33 = arith.constant 0 : index
    %c0_34 = arith.constant 0 : index
    %131 = vector.load %arg3[%c0_33, %c0_34] : memref<8x128xf32, #tpu.memory_space<vmem>>, vector<8x128xf32>
    tpu.vector_store %arg3[%c0_33, %c0_34], %130 {strides = array<i32>} : memref<8x128xf32, #tpu.memory_space<vmem>>, vector<8x128xf32>,
    return
  }
}

</mosaic_0001>

<bundles_post_ra>
// kernel: cara_forward.1
= control target key start
LH: loop header
LB: loop body
LE: loop exit
PB: predicated region body
PF: predicated region fallthrough
CT: control target
= control target key end

     0   :  { %8 = vsyncpa [#allocation3], 0  ;;  %s1377_s12 = smov [#allocation2]   ;;  %s1642_s0 = inlined_call_operand.vmem [shape: s32[32,4], index: 0, kind: input, shape index: {}]   ;;  %s1643_s1 = inlined_call_operand.vmem [shape: f32[32,33], index: 1, kind: input, shape index: {}]   ;;  %s1644_s2 = inlined_call_operand.hbm [shape: f32[256,128], index: 2, kind: input, shape index: {}]   ;;  %s1645_s3 = inlined_call_operand.vmem [shape: f32[8,128], index: 3, kind: output, shape index: {}]  }
   0x1   :  { %s18_s13 = sshll.u32 %s1377_s12, 4  ;;  %s19_s13 = int_to_ptr.vmem [resolvable:$true] %s18_s13 }
   0x2   :  { %s1363_s14 = scalar_lea.vmem %s19_s13, 4096  ;;  %p1368_p1 = scmp.lt.s32.totalorder %s19_s13, %s19_s13 }
   0x3   :  { %p1364_p0 = scmp.ne.s32.totalorder %s19_s13, %s1363_s14  ;;  %p1369_p2 = scmp.lt.s32.totalorder %s1363_s14, %s1363_s14 }
   0x5   :  { %p1370_p3 = por %p1369_p2, %p1368_p1 }
   0x7   :  { %p1371_p4 = pnand %p1370_p3, %p1364_p0 }
   0x9   :  { %1374 = shalt.err (!%p1371_p4)
}
   0xa   :  { %s1378_s15 = smov 128   ;;  %s1379_s16 = smov 8  }
   0xb   :  { %24 = dma.hbm_to_vmem [thread:$0]  %s1644_s2, 4096, %s19_s13, [#allocation3], %s1378_s15, %s1378_s15, %s1379_s16  }
   0xc   :  { %1375 = dma.done.wait [#allocation3], 4096  }
   0xd   :  { %1376 = vsyncadd [#allocation3], 4294963200  ;;  %v1380_v0 = vmov 2   ;;  %v1381_v1 = vmov 0.0   ;;  %v1421_v2 = vld [vmem:[%s1642_s0] sm:$0xff]  ;;  %v66_v3 = vld [vmem:[#allocation2 + $0x28] sm:$0xff]  ;;  %v35_v29 = vlaneseq }
   0xe   :  { %1311 = vset.pattern.permute.xlu0 %v1380_v0  ;;  %1214 = vmatprep.subr.mxu1 %v1381_v1  ;;  %v65_v4 = vld [vmem:[#allocation2 + $0x20] sm:$0xff]  ;;  %v1427_v5 = vld [vmem:[%s1642_s0 + $0x8] sm:$0xff]  ;;  %v64_v6 = vld [vmem:[#allocation2 + $0x18] sm:$0xff]  ;;  %vm190_vm0 = vcmask 269568   ;;  %v1382_v10 = vmov 32   ;;  %vm67_vm1 = vcmask 392192  }
   0xf   :  { %38 = vperm.xlu0 %1311, %v1421_v2   ;;  %1196 = vmatprep.subr.mxu0 %v66_v3  ;;  %v1432_v7 = vld [vmem:[%s1643_s1] sm:$0xff]  ;;  %v33_v8 = vld [vmem:[%s1643_s1 + $0x8] sm:$0xff]  ;;  %v63_v9 = vld [vmem:[#allocation2 + $0x10] sm:$0xff]  ;;  %v1442_v30 = vand.u32 127, %v35_v29  ;;  %vm1383_vm4 = vmmov 0   ;;  %v1384_v43 = vmov 3  }
  0x10   :  { %1197 = vmatpush3.msra.mxu0 %v66_v3  ;;  %1312 = vset.pattern.permute.xlu1 %v1382_v10  ;;  %v198_v11 = vsel %vm190_vm0, %v33_v8, 0.0  ;;  %v191_v12 = vsel %vm190_vm0, %v1432_v7, 0.0  ;;  %v62_v15 = vld [vmem:[#allocation2 + $0x8] sm:$0xff]  ;;  %v61_v18 = vld [vmem:[#allocation2] sm:$0xff]  ;;  %v222_v37 = vld [vmem:[#allocation2 + $0x38] sm:$0xff]  ;;  %v1385_v44 = vmov 0  }
  0x11   :  { %1198 = vmatprep.subr.mxu0 %v65_v4  ;;  %v199_v13 = vrot.slane %v198_v11, 4  ;;  %v192_v14 = vrot.slane %v191_v12, 4  ;;  %165 = vperm.xlu1 %1312, %v1432_v7   ;;  %v224_v35 = vld [vmem:[#allocation2 + $0x48] sm:$0xff]  ;;  %v223_v36 = vld [vmem:[#allocation2 + $0x40] sm:$0xff]  ;;  %v221_v38 = vld [vmem:[#allocation2 + $0x30] sm:$0xff]  ;;  %vm175_vm5 = vcmask 261120  }
  0x12   :  { %1199 = vmatpush3.msra.mxu0 %v65_v4  ;;  %1215 = vmatpush3.msra.mxu1 %v224_v35  ;;  %v1458_v39 = vld [vmem:[%s1642_s0 + $0x10] sm:$0xff]  ;;  %v1463_v40 = vld [vmem:[%s1642_s0 + $0x18] sm:$0xff]  ;;  %v395_v41 = vld [vmem:[#allocation2 + $0x88] sm:$0xff]  ;;  %vm231_vm6 = vcmask 1041409   ;;  %vm615_vm10 = vcmask 523264   ;;  %vm484_vm14 = vcmask 1041408  }
  0x13   :  { %41 = vperm.xlu0 %1311, %v1427_v5   ;;  %1200 = vmatprep.subr.mxu0 %v64_v6  ;;  %v200_v16 = vadd.f32 %v199_v13, %v198_v11  ;;  %v193_v17 = vadd.f32 %v192_v14, %v191_v12  ;;  %v394_v42 = vld [vmem:[#allocation2 + $0x80] sm:$0xff]  ;;  %v393_v45 = vld [vmem:[#allocation2 + $0x78] sm:$0xff]  ;;  %vm480_vm0 = vcmask 15360   ;;  %s1388_s0 = smov 32   ;;  %s1389_s29 = smov 127  }
  0x14   :  { %1201 = vmatpush3.msra.mxu0 %v64_v6  ;;  %1216 = vmatprep.subr.mxu1 %v1381_v1  ;;  %v607_v35 = vld [vmem:[#allocation2 + $0x98] sm:$0xff]  ;;  %s1390_s30 = smov 96   ;;  %s1391_s4 = smov 2  }
  0x15   :  { %1202 = vmatprep.subr.mxu0 %v63_v9  ;;  %v201_v19 = vrot.slane %v200_v16, 2  ;;  %v194_v20 = vrot.slane %v193_v17, 2  ;;  %170 = vperm.xlu1 %1312, %v33_v8   ;;  %s1392_s5 = smov 4   ;;  %s1393_s8 = smov 1.0  }
  0x16   :  { %1203 = vmatpush3.msra.mxu0 %v63_v9  ;;  %1217 = vmatpush3.msra.mxu1 %v223_v36 }
  0x17   :  { %1204 = vmatprep.subr.mxu0 %v62_v15  ;;  %1313 = vset.pattern.permute.xlu0 %v1382_v10  ;;  %v202_v21 = vadd.f32 %v201_v19, %v200_v16  ;;  %v195_v22 = vadd.f32 %v194_v20, %v193_v17  ;;  %v392_v17 = vld [vmem:[#allocation2 + $0x70] sm:$0xff]  ;;  %v613_v19 = vld [vmem:[#allocation2 + $0xc8] sm:$0xff]  ;;  %v612_v20 = vld [vmem:[#allocation2 + $0xc0] sm:$0xff] }
  0x18   :  { %1205 = vmatpush3.msra.mxu0 %v62_v15  ;;  %1218 = vmatprep.subr.mxu1 %v1381_v1 }
  0x19   :  { %1206 = vmatprep.subr.mxu0 %v61_v18  ;;  %v203_v23 = vrot.slane %v202_v21, 1  ;;  %v196_v24 = vrot.slane %v195_v22, 1  ;;  %1222 = vmatprep.mubr.msk.f32.mxu1 %vm1383_vm4, %v1381_v1 }
  0x1a   :  { %1207 = vmatpush3.msra.mxu0 %v61_v18  ;;  %1219 = vmatpush3.msra.mxu1 %v222_v37  ;;  %v614_v18 = vld [vmem:[#allocation2 + $0xd0] sm:$0xff] }
  0x1b   :  { %1236 = vmatprep.subr.mxu0 %v1381_v1  ;;  %v204_v25 = vadd.f32 %v203_v23, %v202_v21  ;;  %v197_v26 = vadd.f32 %v196_v24, %v195_v22  ;;  %1220 = vmatprep.subr.mxu1 %v1381_v1  ;;  %v309_v22 = vld [vmem:[#allocation2 + $0x68] sm:$0xff]  ;;  %v611_v23 = vld [vmem:[#allocation2 + $0xb8] sm:$0xff]  ;;  %v308_v24 = vld [vmem:[#allocation2 + $0x60] sm:$0xff] }
  0x1c   :  { %1221 = vmatpush3.msra.mxu1 %v221_v38 }
  0x1d   :  { %v206_v27 = vmax.f32 %v204_v25, 1.0  ;;  %v205_v28 = vmax.f32 %v197_v26, 1.0  ;;  %1225 = vmatprep.subr.mxu1 %v1381_v1  ;;  %v307_v25 = vld [vmem:[#allocation2 + $0x58] sm:$0xff]  ;;  %v610_v26 = vld [vmem:[#allocation2 + $0xb0] sm:$0xff] }
  0x1f   :  { %214 = vperm.xlu1 %1312, %v206_v27   ;;  %209 = vperm.xlu0 %1313, %v205_v28   ;;  %v306_v27 = vld [vmem:[#allocation2 + $0x50] sm:$0xff]  ;;  %v609_v28 = vld [vmem:[#allocation2 + $0xa8] sm:$0xff] }
  0x23   :  { %1314 = vset.pattern.permute.xlu1 %v1380_v0  ;;  %1315 = vset.pattern.permute.xlu0 %v1380_v0 }
  0x24   :  { %44 = vperm.xlu1 %1314, %v1458_v39   ;;  %47 = vperm.xlu0 %1315, %v1463_v40  }
  0x28   :  { %1316 = vset.pattern.permute.xlu1 %v1384_v43  ;;  %1318 = vset.pattern.permute.xlu0 %v1385_v44 }
  0x29   :  { %474 = vperm.xlu1 %1316, %v1421_v2   ;;  %563 = vperm.xlu0 %1318, %v1427_v5  }
  0x2d   :  { %1317 = vset.pattern.permute.xlu1 %v1385_v44  ;;  %v1514_v44 = vld [vmem:[#allocation2 + $0xf8] sm:$0xff] }
  0x2e   :  { %560 = vperm.xlu1 %1317, %v1421_v2  }
  0x32   :  { %566 = vperm.xlu1 %1317, %v1458_v39  }
  0x36   :  { %569 = vperm.xlu1 %1317, %v1463_v40  }
  0x8a   :  { %v39_v31 = vpop.permute.xlu0 %38 }
  0x8b   :  { %vm49_vm2 = vcmp.eq.s32.totalorder %v39_v31, %v1442_v30 }
  0x8c   :  { %v1113_v32 = vsel %vm49_vm2, 1.0, %v1381_v1  ;;  %v166_v46 = vpop.permute.xlu1 %165 }
  0x8d   :  { %1208 = vmatprep.mubr.msk.f32.mxu0 %vm67_vm1, %v1113_v32 }
  0x8e   :  { %v42_v33 = vpop.permute.xlu0 %41 }
  0x8f   :  { %vm50_vm3 = vcmp.eq.s32.totalorder %v42_v33, %v1442_v30  ;;  %v608_v33 = vld [vmem:[#allocation2 + $0xa0] sm:$0xff] }
  0x90   :  { %v1114_v34 = vsel %vm50_vm3, 1.0, %v1381_v1  ;;  %v171_v47 = vpop.permute.xlu1 %170 }
  0x91   :  { %1209 = vmatmul.mubr.msk.f32.vlgmr.msra.gmra.mxu0 %vm67_vm1, %v1114_v34 }
  0x92   :  { %1237 = vmatpush3.msra.mxu0 %v395_v41 }
  0x93   :  { %1238 = vmatprep.subr.mxu0 %v1381_v1 }
  0x94   :  { %1239 = vmatpush3.msra.mxu0 %v394_v42  ;;  %v1511_v42 = vshrl.u32 %v35_v29, 7 }
  0x95   :  { %1240 = vmatprep.subr.mxu0 %v1381_v1 }
  0x96   :  { %1241 = vmatpush3.msra.mxu0 %v393_v45  ;;  %v227_v43 = vsub.s32 0, %v1511_v42 }
  0x97   :  { %1242 = vmatprep.subr.mxu0 %v1381_v1 }
  0x98   :  { %1243 = vmatpush3.msra.mxu0 %v392_v17  ;;  %v228_v45 = vrot.slane %v1514_v44, %v227_v43 }
  0x99   :  { %1252 = vmatprep.subr.mxu0 %v614_v18 }
  0x9a   :  { %v210_v48 = vpop.permute.xlu0 %209  ;;  %v215_v50 = vpop.permute.xlu1 %214 }
  0x9b   :  { %1331 = vrcp.f32 %v210_v48 }
  0x9c   :  { %1333 = vrcp.f32 %v215_v50 }
  0x9f   :  { %v45_v10 = vpop.permute.xlu1 %44  ;;  %v48_v11 = vpop.permute.xlu0 %47 }
  0xa0   :  { %vm51_vm7 = vcmp.eq.s32.totalorder %v45_v10, %v1442_v30  ;;  %vm52_vm8 = vcmp.eq.s32.totalorder %v48_v11, %v1442_v30 }
  0xa1   :  { %v1115_v14 = vsel %vm51_vm7, 1.0, %v1381_v1  ;;  %v1116_v15 = vsel %vm52_vm8, 1.0, %v1381_v1  ;;  %vm1008_vm8 = vcmp.ge.s32.totalorder %v1511_v42, %v1442_v30 }
  0xa2   :  { %1211 = vmatprep.mubr.msk.f32.mxu0 %vm67_vm1, %v1115_v14 }
  0xa3   :  { %1212 = vmatmul.mubr.msk.f32.gmra.mxu0 %vm67_vm1, %v1116_v15 }
  0xa4   :  { %1244 = vmatprep.mubr.msk.f32.mxu0 %vm1383_vm4, %v1381_v1  ;;  %v1492_v21 = vpop.permute.xlu1 %474  ;;  %v564_v31 = vpop.permute.xlu0 %563 }
  0xa5   :  { %vm572_vm11 = vcmp.eq.s32.totalorder %v564_v31, %v1442_v30  ;;  %vm476_vm15 = vcmp.eq.s32.totalorder %v1492_v21, %v1442_v30 }
  0xa6   :  { %v1128_v36 = vsel %vm572_vm11, 1.0, %v1381_v1  ;;  %v1124_v29 = vsel %vm476_vm15, 1.0, %v1381_v1  ;;  %vm919_vm11 = vcmp.ne.s32.totalorder %v1421_v2, 0  ;;  %vm951_vm15 = vcmask 7168  }
  0xa7   :  { %1245 = vmatmul.mubr.msk.f32.vlgmr.msra.gmra.mxu0 %vm175_vm5, %v1432_v7 }
  0xa8   :  { %v1332_v6 = vpop.eup %1331  ;;  %1253 = vmatpush3.msra.mxu0 %v614_v18 }
  0xa9   :  { %v1334_v9 = vpop.eup %1333  ;;  %1254 = vmatprep.subr.mxu0 %v613_v19  ;;  %v561_v7 = vpop.permute.xlu1 %560 }
  0xaa   :  { %1255 = vmatpush3.msra.mxu0 %v613_v19  ;;  %vm571_vm9 = vcmp.eq.s32.totalorder %v561_v7, %v1442_v30 }
  0xab   :  { %1256 = vmatprep.subr.mxu0 %v612_v20  ;;  %v1127_v32 = vsel %vm571_vm9, 1.0, %v1381_v1 }
  0xac   :  { %1257 = vmatpush3.msra.mxu0 %v612_v20  ;;  %1268 = vmatprep.mubr.msk.f32.mxu0 %vm615_vm10, %v1127_v32 }
  0xad   :  { %1258 = vmatprep.subr.mxu0 %v611_v23  ;;  %v567_v34 = vpop.permute.xlu1 %566 }
  0xae   :  { %1259 = vmatpush3.msra.mxu0 %v611_v23  ;;  %vm573_vm12 = vcmp.eq.s32.totalorder %v567_v34, %v1442_v30 }
  0xaf   :  { %1260 = vmatprep.subr.mxu0 %v610_v26  ;;  %v1129_v37 = vsel %vm573_vm12, 1.0, %v1381_v1  ;;  %vm921_vm12 = vcmp.ne.s32.totalorder %v1458_v39, 0 }
  0xb0   :  { %1261 = vmatpush3.msra.mxu0 %v610_v26 }
  0xb1   :  { %1262 = vmatprep.subr.mxu0 %v609_v28  ;;  %v570_v38 = vpop.permute.xlu1 %569 }
  0xb2   :  { %1263 = vmatpush3.msra.mxu0 %v609_v28  ;;  %vm574_vm13 = vcmp.eq.s32.totalorder %v570_v38, %v1442_v30 }
  0xb3   :  { %1264 = vmatprep.subr.mxu0 %v608_v33  ;;  %v1130_v41 = vsel %vm574_vm13, 1.0, %v1381_v1  ;;  %vm922_vm13 = vcmp.ne.s32.totalorder %v1463_v40, 0 }
  0xb4   :  { %1265 = vmatpush3.msra.mxu0 %v608_v33 }
  0xb5   :  { %1266 = vmatprep.subr.mxu0 %v607_v35 }
  0xb6   :  { %1267 = vmatpush3.msra.mxu0 %v607_v35 }
  0xb7   :  { %1269 = vmatmul.mubr.msk.f32.vlgmr.msra.gmra.mxu0 %vm615_vm10, %v1128_v36 }
  0xb8   :  { %1271 = vmatprep.mubr.msk.f32.mxu0 %vm615_vm10, %v1129_v37 }
  0xbb   :  { %1272 = vmatmul.mubr.msk.f32.gmra.mxu0 %vm615_vm10, %v1130_v41 }
 0x151   :  { %v1210_v49 = vpop.f32.mrf.mxu0 }
 0x152   :  { %v174_v51 = vmul.f32 %v1210_v49, %v171_v47 }
 0x153   :  { %v146_v52 = vpop.f32.mrf.mxu0 }
 0x154   :  { %v183_v53 = vsel %vm175_vm5, %v174_v51, 0.0  ;;  %v173_v54 = vmul.f32 %v166_v46, %v146_v52  ;;  %v479_v51 = vld [vmem:[#allocation2 + $0x90] sm:$0x3] }
 0x155   :  { %v184_v55 = vrot.slane %v183_v53, 4 }
 0x156   :  { %v176_v56 = vsel %vm175_vm5, %v173_v54, 0.0 }
 0x157   :  { %v185_v57 = vadd.f32 %v184_v55, %v183_v53  ;;  %v177_v58 = vrot.slane %v176_v56, 4  ;;  %v753_v55 = vld [vmem:[#allocation2 + $0xf0] sm:$0xff] }
 0x159   :  { %v186_v59 = vrot.slane %v185_v57, 2  ;;  %v178_v60 = vadd.f32 %v177_v58, %v176_v56  ;;  %v752_v56 = vld [vmem:[#allocation2 + $0xe8] sm:$0xff]  ;;  %v750_v58 = vld [vmem:[#allocation2 + $0xd8] sm:$0xff] }
 0x15b   :  { %v187_v61 = vadd.f32 %v186_v59, %v185_v57  ;;  %v179_v62 = vrot.slane %v178_v60, 2  ;;  %v751_v57 = vld [vmem:[#allocation2 + $0xe0] sm:$0xff]  ;;  %v1386_v59 = vmov 1966171168  }
 0x15d   :  { %v188_v63 = vrot.slane %v187_v61, 1  ;;  %v180_v0 = vadd.f32 %v179_v62, %v178_v60  ;;  %v715_v60 = vunpack.c.l.s4 %v1386_v59 }
 0x15f   :  { %v189_v3 = vadd.f32 %v188_v63, %v187_v61  ;;  %v181_v4 = vrot.slane %v180_v0, 1  ;;  %v716_v61 = vunpack.c.0.s8 %v715_v60 }
 0x161   :  { %v182_v8 = vadd.f32 %v181_v4, %v180_v0  ;;  %v220_v13 = vmul.f32 %v1334_v9, %v189_v3  ;;  %v719_v3 = vsub.s32 %v716_v61, %v1511_v42 }
 0x163   :  { %v218_v12 = vmul.f32 %v1332_v6, %v182_v8  ;;  %v1213_v47 = vpop.f32.mrf.mxu0 }
 0x165   :  { %v232_v16 = vsel %vm231_vm6, %v220_v13, %v218_v12  ;;  %v156_v50 = vpop.f32.mrf.mxu0 }
 0x166   :  { %1223 = vmatmul.mubr.msk.f32.vlgmr.msra.gmra.mxu1 %vm175_vm5, %v232_v16 }
 0x167   :  { %1233 = vmatprep.mubr.msk.f32.mxu1 %vm1383_vm4, %v1381_v1  ;;  %1226 = vmatpush3.msra.mxu1 %v309_v22  ;;  %v1525_v53 = vpop.f32.mrf.mxu0  ;;  %v1387_v22 = vmov 1  }
 0x168   :  { %1227 = vmatprep.subr.mxu1 %v1381_v1  ;;  %1319 = vset.pattern.permute.xlu1 %v1387_v22 }
 0x169   :  { %1228 = vmatpush3.msra.mxu1 %v308_v24  ;;  %v1246_v54 = vpop.f32.mrf.mxu0  ;;  %1320 = vset.pattern.permute.xlu0 %v1387_v22  ;;  %v1143_v22 = vsel %vm919_vm11, 1.0, %v1381_v1 }
 0x16a   :  { %1229 = vmatprep.subr.mxu1 %v1381_v1 }
 0x16b   :  { %1230 = vmatpush3.msra.mxu1 %v307_v25 }
 0x16c   :  { %1231 = vmatprep.subr.mxu1 %v1381_v1 }
 0x16d   :  { %1232 = vmatpush3.msra.mxu1 %v306_v27 }
 0x16e   :  { %1247 = vmatprep.subr.mxu1 %v1381_v1 }
 0x177   :  { %v1529_v63 = vpop.f32.mrf.mxu0 }
 0x179   :  { %v1533_v8 = vpop.f32.mrf.mxu0 }
 0x17b   :  { %v1535_v13 = vpop.f32.mrf.mxu0 }
 0x17d   :  { %v1539_v19 = vpop.f32.mrf.mxu0 }
 0x226   :  { %v301_v46 = vpop.f32.mrf.mxu1 }
 0x227   :  { %v302_v48 = vadd.f32 %v301_v46, %v228_v45 }
 0x228   :  { %v1224_v49 = vpop.f32.mrf.mxu1 }
 0x229   :  { %1335 = vtanh.f32 %v302_v48 }
 0x236   :  { %v1336_v52 = vpop.eup %1335 }
 0x237   :  { %1234 = vmatmul.mubr.msk.f32.vlgmr.msra.gmra.mxu1 %vm175_vm5, %v1336_v52 }
 0x238   :  { %1248 = vmatpush3.msk.msra.mxu1 %vm484_vm14, %v479_v51  ;;  %1249 = vmatprep.mubr.msk.f32.mxu1 %vm1383_vm4, %v1381_v1 }
 0x239   :  { %1274 = vmatprep.subr.mxu1 %v753_v55 }
 0x23b   :  { %1250 = vmatmul.mubr.msk.f32.vlgmr.msra.gmra.mxu1 %vm480_vm0, %v1124_v29 }
 0x23c   :  { %1275 = vmatpush3.msra.mxu1 %v753_v55 }
 0x23d   :  { %1276 = vmatprep.subr.mxu1 %v752_v56 }
 0x23e   :  { %1277 = vmatpush3.msra.mxu1 %v752_v56 }
 0x23f   :  { %1278 = vmatprep.subr.mxu1 %v751_v57 }
 0x240   :  { %1279 = vmatpush3.msra.mxu1 %v751_v57 }
 0x241   :  { %1280 = vmatprep.subr.mxu1 %v750_v58 }
 0x242   :  { %1281 = vmatpush3.msra.mxu1 %v750_v58 }
 0x2f7   :  { %v1527_v62 = vpop.f32.mrf.mxu1 }
 0x2f9   :  { %v1235_v0 = vpop.f32.mrf.mxu1 }
 0x2fb   :  { %v554_v4 = vpop.f32.mrf.mxu1 }
 0x2fc   :  { %v558_v6 = vadd.f32 %v554_v4, %v1527_v62 }
 0x2fd   :  { %v1251_v9 = vpop.f32.mrf.mxu1 }
 0x2fe   :  { %v720_v10 = vrot.slane %v558_v6, %v719_v3 }
 0x300   :  { %v721_v11 = vcombine.high %v720_v10, %v720_v10  ;;  %v728_v12 = vrot.slane %v720_v10, %v719_v3 }
 0x302   :  { %v739_v14 = vrot.slane %v728_v12, %v227_v43  ;;  %v735_v15 = vrot.slane %v721_v11, %v719_v3 }
 0x304   :  { %v747_v16 = vadd.f32 %v1529_v63, %v739_v14  ;;  %v743_v17 = vrot.slane %v735_v15, %v227_v43  ;;  %v746_v18 = vadd.f32 %v739_v14, %v1533_v8 }
 0x306   :  { %v748_v20 = vadd.f32 %v743_v17, %v1539_v19  ;;  %1282 = vmatprep.mubr.msk.f32.mxu1 %vm175_vm5, %v746_v18  ;;  %v749_v21 = vadd.f32 %v1535_v13, %v743_v17  ;;  %v1010_v17 = vadd.s32 13, %v1442_v30  ;;  %v1147_v18 = vsel %vm1008_vm8, 1.0, %v1381_v1 }
 0x307   :  { %1283 = vmatmul.mubr.msk.f32.vlgmr.msra.gmra.mxu1 %vm175_vm5, %v747_v16  ;;  %v1007_v16 = vadd.s32 8, %v1511_v42 }
 0x308   :  { %1285 = vmatprep.mubr.msk.f32.mxu1 %vm175_vm5, %v748_v20 }
 0x309   :  { %vm1012_vm7 = vcmp.le.s32.totalorder %v1007_v16, %v1010_v17 }
 0x30b   :  { %1286 = vmatmul.mubr.msk.f32.gmra.mxu1 %vm175_vm5, %v749_v21  ;;  %vm1009_vm5 = vcmp.ge.s32.totalorder %v1007_v16, %v1442_v30 }
 0x30c   :  { %vm1014_vm9 = vmand %vm1009_vm5, %vm1012_vm7 }
 0x30d   :  { %v1148_v20 = vsel %vm1014_vm9, 1.0, %v1381_v1 }
 0x30e   :  { %v1321_v21 = vpack.i.bf16 %v1148_v20, %v1147_v18 }
 0x3c7   :  { %v1284_v23 = vpop.f32.mrf.mxu1 }
 0x3c8   :  { %v854_v24 = vsel %vm615_vm10, %v1284_v23, -inf }
 0x3c9   :  { %855 = vmax.xlane.f32.xlu1 %v854_v24  ;;  %v832_v25 = vpop.f32.mrf.mxu1 }
 0x3ca   :  { %v851_v26 = vsel %vm615_vm10, %v832_v25, -inf }
 0x3cb   :  { %852 = vmax.xlane.f32.xlu0 %v851_v26  ;;  %v1287_v7 = vpop.f32.mrf.mxu1 }
 0x3cc   :  { %v860_v31 = vsel %vm615_vm10, %v1287_v7, -inf }
 0x3cd   :  { %v842_v27 = vpop.f32.mrf.mxu1 }
 0x3ce   :  { %v857_v28 = vsel %vm615_vm10, %v842_v27, -inf }
 0x3cf   :  { %858 = vmax.xlane.f32.xlu0 %v857_v28 }
 0x3d3   :  { %861 = vmax.xlane.f32.xlu0 %v860_v31 }
 0x3da   :  { %584 = vperm.xlu1 %1319, %v1421_v2  }
 0x3de   :  { %590 = vperm.xlu1 %1319, %v1458_v39  }
 0x3e2   :  { %593 = vperm.xlu1 %1319, %v1463_v40  }
 0x3e9   :  { %587 = vperm.xlu0 %1320, %v1427_v5  }
 0x452   :  { %v1555_v32 = vpop.xlane.xlu1 %855 }
 0x453   :  { %v864_v33 = vsub.f32 %v1284_v23, %v1555_v32 }
 0x454   :  { %v1558_v34 = vpop.xlane.xlu0 %852 }
 0x455   :  { %v869_v35 = vmul.f32 1.442695, %v864_v33  ;;  %v863_v36 = vsub.f32 %v832_v25, %v1558_v34 }
 0x456   :  { %v585_v37 = vpop.permute.xlu1 %584 }
 0x457   :  { %1337 = vpow2.f32 %v869_v35  ;;  %v867_v38 = vmul.f32 1.442695, %v863_v36  ;;  %vm595_vm2 = vcmp.eq.s32.totalorder %v585_v37, %v1442_v30 }
 0x458   :  { %v1561_v41 = vpop.xlane.xlu0 %858  ;;  %v1131_v61 = vsel %vm595_vm2, 1.0, %v1381_v1  ;;  %vm1100_vm2 = vcmask 31744  }
 0x459   :  { %1339 = vpow2.f32 %v867_v38  ;;  %v865_v43 = vsub.f32 %v842_v27, %v1561_v41  ;;  %v899_v4 = vmul.f32 %v1131_v61, %v832_v25 }
 0x45a   :  { %v591_v45 = vpop.permute.xlu1 %590 }
 0x45b   :  { %v871_v46 = vmul.f32 1.442695, %v865_v43  ;;  %vm597_vm4 = vcmp.eq.s32.totalorder %v591_v45, %v1442_v30  ;;  %v903_v9 = vsel %vm615_vm10, %v899_v4, 0.0 }
 0x45c   :  { %v1564_v47 = vpop.xlane.xlu0 %861  ;;  %v1133_v11 = vsel %vm597_vm4, 1.0, %v1381_v1  ;;  %vm1104_vm4 = vcmask 48128  }
 0x45d   :  { %1341 = vpow2.f32 %v871_v46  ;;  %v866_v48 = vsub.f32 %v1287_v7, %v1564_v47  ;;  %v901_v14 = vmul.f32 %v1133_v11, %v842_v27 }
 0x45e   :  { %v594_v49 = vpop.permute.xlu1 %593 }
 0x45f   :  { %v873_v50 = vmul.f32 1.442695, %v866_v48  ;;  %vm598_vm1 = vcmp.eq.s32.totalorder %v594_v49, %v1442_v30  ;;  %v909_v15 = vsel %vm615_vm10, %v901_v14, 0.0 }
 0x460   :  { %v1134_v51 = vsel %vm598_vm1, 1.0, %v1381_v1  ;;  %vm1047_vm1 = vcmask 23552  }
 0x461   :  { %1343 = vpow2.f32 %v873_v50  ;;  %v902_v54 = vmul.f32 %v1287_v7, %v1134_v51 }
 0x463   :  { %v912_v57 = vsel %vm615_vm10, %v902_v54, 0.0 }
 0x464   :  { %v1338_v52 = vpop.eup %1337  ;;  %v588_v59 = vpop.permute.xlu0 %587 }
 0x465   :  { %v878_v29 = vsel %vm615_vm10, %v1338_v52, 0.0  ;;  %vm596_vm3 = vcmp.eq.s32.totalorder %v588_v59, %v1442_v30  ;;  %v1145_v30 = vsel %vm921_vm12, 1.0, %v1381_v1  ;;  %v1146_v52 = vsel %vm922_vm13, 1.0, %v1381_v1 }
 0x466   :  { %v1340_v55 = vpop.eup %1339  ;;  %879 = vadd.xlane.f32.xlu0 %v878_v29  ;;  %v1132_v6 = vsel %vm596_vm3, 1.0, %v1381_v1  ;;  %vm1102_vm3 = vcmask 39936  }
 0x467   :  { %v875_v56 = vsel %vm615_vm10, %v1340_v55, 0.0  ;;  %v900_v10 = vmul.f32 %v1284_v23, %v1132_v6 }
 0x468   :  { %876 = vadd.xlane.f32.xlu1 %v875_v56 }
 0x469   :  { %v906_v12 = vsel %vm615_vm10, %v900_v10, 0.0 }
 0x46a   :  { %v1342_v58 = vpop.eup %1341  ;;  %913 = vadd.xlane.f32.xlu0 %v912_v57 }
 0x46b   :  { %v881_v60 = vsel %vm615_vm10, %v1342_v58, 0.0 }
 0x46c   :  { %882 = vadd.xlane.f32.xlu1 %v881_v60 }
 0x46e   :  { %v1344_v0 = vpop.eup %1343 }
 0x46f   :  { %v884_v3 = vsel %vm615_vm10, %v1344_v0, 0.0  ;;  %vm920_vm10 = vcmp.ne.s32.totalorder %v1427_v5, 0 }
 0x470   :  { %885 = vadd.xlane.f32.xlu1 %v884_v3  ;;  %v1144_v23 = vsel %vm920_vm10, 1.0, %v1381_v1 }
 0x471   :  { %v1326_v24 = vpack.i.bf16 %v1144_v23, %v1143_v22 }
 0x474   :  { %904 = vadd.xlane.f32.xlu1 %v903_v9 }
 0x478   :  { %907 = vadd.xlane.f32.xlu1 %v906_v12 }
 0x47c   :  { %910 = vadd.xlane.f32.xlu1 %v909_v15 }
 0x48d   :  { %1322 = vrot.lane.b32.xlu1 %v1321_v21, %s1388_s0 }
 0x491   :  { %1327 = vrot.lane.b32.xlu1 %v1326_v24, %s1389_s29 }
 0x495   :  { %976 = vrot.lane.b32.xlu1 %v1145_v30, %s1389_s29 }
 0x4ef   :  { %v880_v2 = vpop.xlane.xlu0 %879 }
 0x4f0   :  { %1345 = vlog2.f32 %v880_v2 }
 0x4f1   :  { %v877_v5 = vpop.xlane.xlu1 %876 }
 0x4f2   :  { %1347 = vlog2.f32 %v877_v5 }
 0x4f3   :  { %v914_v40 = vpop.xlane.xlu0 %913 }
 0x4f5   :  { %v883_v25 = vpop.xlane.xlu1 %882 }
 0x4f6   :  { %1349 = vlog2.f32 %v883_v25 }
 0x4f9   :  { %v886_v26 = vpop.xlane.xlu1 %885 }
 0x4fa   :  { %1351 = vlog2.f32 %v886_v26 }
 0x4fd   :  { %v1346_v7 = vpop.eup %1345  ;;  %v905_v27 = vpop.xlane.xlu1 %904 }
 0x4fe   :  { %v890_v28 = vmul.f32 0.6931472, %v1346_v7 }
 0x4ff   :  { %v1348_v31 = vpop.eup %1347 }
 0x500   :  { %v888_v39 = vmul.f32 0.6931472, %v1348_v31  ;;  %v896_v33 = vadd.f32 %v890_v28, %v1555_v32  ;;  %v385_v31 = vsub.s32 1, %v1511_v42 }
 0x501   :  { %v908_v35 = vpop.xlane.xlu1 %907 }
 0x502   :  { %v895_v36 = vadd.f32 %v888_v39, %v1558_v34  ;;  %v916_v37 = vsub.f32 %v896_v33, %v908_v35  ;;  %v470_v39 = vsub.s32 2, %v1511_v42  ;;  %v386_v33 = vrot.slane %v1514_v44, %v385_v31 }
 0x503   :  { %v1350_v38 = vpop.eup %1349 }
 0x504   :  { %v892_v43 = vmul.f32 0.6931472, %v1350_v38  ;;  %v915_v45 = vsub.f32 %v895_v36, %v905_v27  ;;  %v932_v46 = vmul.f32 %v1144_v23, %v916_v37  ;;  %v471_v35 = vrot.slane %v1514_v44, %v470_v39 }
 0x505   :  { %v911_v48 = vpop.xlane.xlu1 %910 }
 0x506   :  { %v931_v49 = vmul.f32 %v1143_v22, %v915_v45  ;;  %v897_v50 = vadd.f32 %v892_v43, %v1561_v41  ;;  %941 = vrot.lane.b32.xlu1 %v932_v46, %s1389_s29  ;;  %v472_v36 = vadd.f32 %v471_v35, %v1525_v53 }
 0x507   :  { %v1352_v51 = vpop.eup %1351 }
 0x508   :  { %v894_v32 = vmul.f32 0.6931472, %v1352_v51  ;;  %v917_v29 = vsub.f32 %v897_v50, %v911_v48  ;;  %939 = vrot.lane.b32.xlu0 %v931_v49, %s1389_s29 }
 0x509   :  { %v1323_v34 = vpop.permute.xlu1 %1322 }
 0x50a   :  { %v898_v54 = vadd.f32 %v894_v32, %v1564_v47  ;;  %v933_v55 = vmul.f32 %v1145_v30, %v917_v29  ;;  %v1325_v56 = vunpack.i.h.bf16 %v1323_v34  ;;  %978 = vrot.lane.b32.xlu1 %v1146_v52, %s1389_s29  ;;  %v1324_v1 = vunpack.i.l.bf16 %v1323_v34 }
 0x50c   :  { %v1030_v57 = vmul.f32 %v1325_v56, %v1535_v13  ;;  %943 = vrot.lane.b32.xlu0 %v933_v55, %s1389_s29  ;;  %v918_v41 = vsub.f32 %v898_v54, %v914_v40  ;;  %v1028_v59 = vmul.f32 %v1325_v56, %v1529_v63  ;;  %v1029_v47 = vmul.f32 %v1324_v1, %v1539_v19 }
 0x50d   :  { %v1027_v13 = vmul.f32 %v1324_v1, %v1533_v8  ;;  %v1328_v60 = vpop.permute.xlu1 %1327 }
 0x50e   :  { %1041 = vrot.lane.b32.xlu1 %v1030_v57, %s1390_s30  ;;  %v934_v58 = vmul.f32 %v1146_v52, %v918_v41  ;;  %v1330_v61 = vunpack.i.h.bf16 %v1328_v60  ;;  %v1329_v0 = vunpack.i.l.bf16 %v1328_v60 }
 0x510   :  { %945 = vrot.lane.b32.xlu0 %v934_v58, %s1389_s29  ;;  %v985_v4 = vsel %vm951_vm15, %v1330_v61, 0.0  ;;  %v984_v63 = vsel %vm951_vm15, %v1329_v0, 0.0 }
 0x511   :  { %v977_v3 = vpop.permute.xlu1 %976  ;;  %v986_v6 = vadd.f32 %v985_v4, %v984_v63 }
 0x512   :  { %1037 = vrot.lane.b32.xlu1 %v1028_v59, %s1390_s30  ;;  %v987_v9 = vsel %vm951_vm15, %v977_v3, 0.0  ;;  %v1078_v3 = vsub.s32 3, %v1511_v42 }
 0x513   :  { %v988_v19 = vadd.f32 %v987_v9, %v986_v6 }
 0x514   :  { %1039 = vrot.lane.b32.xlu0 %v1029_v47, %s1390_s30 }
 0x518   :  { %1035 = vrot.lane.b32.xlu0 %v1027_v13, %s1390_s30 }
 0x578   :  { %v942_v10 = vpop.permute.xlu1 %941 }
 0x579   :  { %v953_v17 = vsel %vm951_vm15, %v942_v10, 0.0 }
 0x57a   :  { %v940_v11 = vpop.permute.xlu0 %939 }
 0x57b   :  { %v952_v14 = vsel %vm951_vm15, %v940_v11, 0.0 }
 0x57c   :  { %v979_v12 = vpop.permute.xlu1 %978  ;;  %v954_v20 = vadd.f32 %v953_v17, %v952_v14 }
 0x57d   :  { %v989_v8 = vsel %vm951_vm15, %v979_v12, 0.0 }
 0x57e   :  { %v944_v15 = vpop.permute.xlu0 %943  ;;  %v990_v16 = vadd.f32 %v989_v8, %v988_v19 }
 0x57f   :  { %v955_v18 = vsel %vm951_vm15, %v944_v15, 0.0 }
 0x580   :  { %991 = vadd.xlane.f32.xlu1 %v990_v16  ;;  %v956_v21 = vadd.f32 %v955_v18, %v954_v20  ;;  %v1042_v2 = vpop.permute.xlu1 %1041 }
 0x581   :  { %v1057_v7 = vsel %vm1047_vm1, %v1042_v2, 0.0 }
 0x582   :  { %v946_v22 = vpop.permute.xlu0 %945 }
 0x583   :  { %v957_v23 = vsel %vm951_vm15, %v946_v22, 0.0 }
 0x584   :  { %v958_v24 = vadd.f32 %v957_v23, %v956_v21  ;;  %v1038_v27 = vpop.permute.xlu1 %1037 }
 0x585   :  { %v1051_v28 = vsel %vm1047_vm1, %v1038_v27, 0.0 }
 0x586   :  { %959 = vadd.xlane.f32.xlu0 %v958_v24  ;;  %v1040_v30 = vpop.permute.xlu0 %1039 }
 0x587   :  { %v1054_v5 = vsel %vm1047_vm1, %v1040_v30, 0.0 }
 0x58a   :  { %1055 = vadd.xlane.f32.xlu0 %v1054_v5  ;;  %v1036_v25 = vpop.permute.xlu0 %1035 }
 0x58b   :  { %v1048_v26 = vsel %vm1047_vm1, %v1036_v25, 0.0 }
 0x58c   :  { %1049 = vadd.xlane.f32.xlu1 %v1048_v26 }
 0x58e   :  { %1058 = vadd.xlane.f32.xlu0 %v1057_v7 }
 0x592   :  { %1052 = vadd.xlane.f32.xlu0 %v1051_v28 }
 0x59d   :  { %388 = vrot.lane.b32.xlu1 %v386_v33, %s1388_s0 }
 0x5a1   :  { %1089 = vrot.lane.b32.xlu1 %v472_v36, %s1391_s4 }
 0x609   :  { %v992_v37 = vpop.xlane.xlu1 %991 }
 0x60a   :  { %v993_v38 = vrot.slane %v992_v37, 4 }
 0x60c   :  { %v994_v43 = vadd.f32 %v993_v38, %v992_v37 }
 0x60e   :  { %v995_v45 = vrot.slane %v994_v43, 2 }
 0x60f   :  { %v960_v46 = vpop.xlane.xlu0 %959 }
 0x610   :  { %v961_v48 = vrot.slane %v960_v46, 4  ;;  %v996_v51 = vadd.f32 %v995_v45, %v994_v43 }
 0x612   :  { %v962_v49 = vadd.f32 %v961_v48, %v960_v46  ;;  %v997_v54 = vrot.slane %v996_v51, 1 }
 0x613   :  { %v1056_v50 = vpop.xlane.xlu0 %1055 }
 0x614   :  { %v963_v52 = vrot.slane %v962_v49, 2  ;;  %v998_v58 = vadd.f32 %v997_v54, %v996_v51 }
 0x615   :  { %v1050_v32 = vpop.xlane.xlu1 %1049 }
 0x616   :  { %v964_v29 = vadd.f32 %v963_v52, %v962_v49 }
 0x617   :  { %v1059_v34 = vpop.xlane.xlu0 %1058 }
 0x618   :  { %v1067_v55 = vadd.f32 %v1059_v34, %v1056_v50  ;;  %v965_v56 = vrot.slane %v964_v29, 1 }
 0x619   :  { %v389_v40 = vpop.permute.xlu1 %388 }
 0x61a   :  { %v1068_v53 = vrot.slane %v1067_v55, 4  ;;  %v391_v57 = vadd.f32 %v389_v40, %v1527_v62  ;;  %v966_v41 = vadd.f32 %v965_v56, %v964_v29  ;;  %v1079_v62 = vrot.slane %v1514_v44, %v1078_v3 }
 0x61b   :  { %v1053_v1 = vpop.xlane.xlu0 %1052 }
 0x61c   :  { %v1069_v59 = vadd.f32 %v1068_v53, %v1067_v55  ;;  %v1060_v47 = vadd.f32 %v1053_v1, %v1050_v32  ;;  %1085 = vrot.lane.b32.xlu0 %v391_v57, %s1390_s30  ;;  %1288 = vpush %v966_v41 }
 0x61d   :  { %1290 = vpush %v998_v58  ;;  %v1090_v44 = vpop.permute.xlu1 %1089 }
 0x61e   :  { %v1070_v13 = vrot.slane %v1069_v59, 2  ;;  %v1061_v60 = vrot.slane %v1060_v47, 4 }
 0x620   :  { %v1071_v61 = vadd.f32 %v1070_v13, %v1069_v59  ;;  %v1062_v0 = vadd.f32 %v1061_v60, %v1060_v47 }
 0x622   :  { %v1072_v4 = vrot.slane %v1071_v61, 1  ;;  %v1063_v63 = vrot.slane %v1062_v0, 2 }
 0x624   :  { %v1073_v6 = vadd.f32 %v1072_v4, %v1071_v61  ;;  %v1064_v9 = vadd.f32 %v1063_v63, %v1062_v0 }
 0x626   :  { %v1075_v10 = vmul.f32 0.071428575, %v1073_v6  ;;  %v1065_v19 = vrot.slane %v1064_v9, 1 }
 0x628   :  { %v1066_v11 = vadd.f32 %v1065_v19, %v1064_v9  ;;  %v1081_v12 = vadd.f32 %v1079_v62, %v1075_v10 }
 0x62a   :  { %v1074_v8 = vmul.f32 0.071428575, %v1066_v11  ;;  %v1094_v15 = vrot.slane %v1081_v12, 7 }
 0x62c   :  { %v1080_v14 = vadd.f32 %v1079_v62, %v1074_v8 }
 0x62e   :  { %v1095_v16 = vsel %vm231_vm6, %v1094_v15, %v1080_v14 }
 0x62f   :  { %1096 = vrot.lane.b32.xlu1 %v1095_v16, %s1392_s5 }
 0x64d   :  { %s1289_s6 = spop %1288 }
 0x64e   :  { %s1291_s7 = spop %1290 }
 0x64f   :  { %s1000_s9 = smax.f32 %s1393_s8, %s1291_s7 }
 0x650   :  { %v1001_v42 = vstv %s1000_s9 }
 0x651   :  { %1353 = vrcp.f32 %v1001_v42 }
 0x65e   :  { %v1354_v17 = vpop.eup %1353 }
 0x65f   :  { %1292 = vpush %v1354_v17 }
 0x68e   :  { %v1086_v18 = vpop.permute.xlu0 %1085 }
 0x68f   :  { %v1099_v20 = vsel %vm480_vm0, %v1086_v18, %v1090_v44 }
 0x690   :  { %s1293_s10 = spop %1292 }
 0x691   :  { %s1004_s11 = smul.f32 %s1293_s10, %s1289_s6 }
 0x693   :  { %v1082_v22 = vstv %s1004_s11 }
 0x6a1   :  { %v1097_v21 = vpop.permute.xlu1 %1096 }
 0x6a2   :  { %v1101_v23 = vsel %vm1100_vm2, %v1099_v20, %v1097_v21 }
 0x6a3   :  { %v1103_v24 = vsel %vm1102_vm3, %v1101_v23, %v1082_v22 }
 0x6a4   :  { %v1105_v30 = vsel %vm1104_vm4, %v1103_v24, 0.0 }
 0x6a5   :  { %v1106_v2 = vsel %vm484_vm14, %v1105_v30, 0.0 }
 0x6a6   :  { %1107 = vst [vmem:[%s1645_s3] sm:$0xff] %v1106_v2 }
 0x6a7   :  { %1112 = vsyncpa [#allocation3], 1 }

</bundles_post_ra>
